<compile_context>
chip_gen: v5e
topology: v5e:2x2
jax: 0.10.0
libtpu: 0.0.40
codegen_flags: <defaults>
</compile_context>

<pallas_src>
import numpy as np
import jax
import jax.numpy as jnp
from jax.experimental import pallas as pl
from jax.experimental.pallas import tpu as pltpu


def _make_kernel(B, Hp, Wp, Cb):
    """Cb = 2*(C//2) == C : both squeeze blocks batched on the channel axis.
    WL = Wp*Cb is the half-res lane width; full-res lane width W*C = 2*WL."""
    WL = Wp * Cb
    f32 = jnp.float32

    def kernel(x_ref, wcat_ref, adw_ref, wup_ref, am_ref, o_ref):
        # x_ref / o_ref: (B*Hp, 2*W*C); lane = parity*W*C + w*C + c (flat NHWC).
        x2 = x_ref[...]                                    # residual kept in f32

        # AvgPool2d(2) + conv1(1x1, C->C2) + block duplication + the depthwise
        # 3x3's horizontal taps (all three kh rows): ONE bf16 MXU matmul with
        # K = 2*W*C (both row parities consumed at once).
        q = jnp.dot(x2.astype(jnp.bfloat16), wcat_ref[...],
                    preferred_element_type=f32)            # (B*Hp, 3*WL)
        q = q.reshape(B, Hp, 3 * WL)

        # Vertical taps: acc[i] = q_kh0[i-1] + q_kh1[i] + q_kh2[i+1], zero-padded
        # at the image boundaries (two sublane-shifted adds, per image).
        zrow = jnp.zeros((B, 1, WL), f32)
        acc = (jnp.concatenate([zrow, q[:, :Hp - 1, 0:WL]], axis=1)
               + q[:, :, WL:2 * WL]
               + jnp.concatenate([q[:, 1:, 2 * WL:3 * WL], zrow], axis=1))

        # Per-block PReLU (per-lane alpha pattern), f32.
        acc = jnp.where(acc > 0, acc, acc * adw_ref[0])

        # Fused pwconv(1x1) + ConvTranspose2d(2, stride 2), both blocks AND both
        # output-row parities: one bf16 matmul whose lanes are already in final
        # (parity, w, channel) order -> no concat / stack / transpose.
        up = jnp.dot(acc.reshape(B * Hp, WL).astype(jnp.bfloat16), wup_ref[...],
                     preferred_element_type=f32)           # (B*Hp, 2*W*C)

        out = up + x2                                      # residual, f32
        am = am_ref[0]
        o_ref[...] = jnp.where(out > 0, out, am * out)     # one dense 256-lane store

    return kernel


def _prepare_weights(C, W, w1, dw1, pw1, up1, dw2, pw2, up2, a1, a2, am_s):
    """Fold the whole linear chain into two lane-dense weights (plumbing only)."""
    f32 = jnp.float32
    C2 = C // 2
    Cb = 2 * C2
    Wp = W // 2
    WL = Wp * Cb

    # --- AvgPool(0.25) + conv1 + channel duplication, kron-expanded over Wp ---
    w1m = jnp.transpose(w1[:, :, 0, 0]).astype(f32)                 # (C, C2) [cin, cout]
    w1dup = jnp.concatenate([w1m, w1m], axis=1)                     # (C, Cb)
    pool_w = jnp.repeat(jnp.eye(Wp, dtype=f32), 2, axis=0) * 0.25   # (W, Wp)
    wpc = jnp.kron(pool_w, w1dup)                                   # (W*C, WL)
    wpc2 = jnp.concatenate([wpc, wpc], axis=0)                      # (2*W*C, WL): row pair

    # --- depthwise taps, both blocks batched on channels ----------------------
    dwb = jnp.concatenate([jnp.transpose(dw1[:, 0], (1, 2, 0)),
                           jnp.transpose(dw2[:, 0], (1, 2, 0))],
                          axis=-1).astype(f32)                      # (3, 3, Cb) [kh,kw,c]

    # --- fold horizontal taps: Wk[kh] = wpc2 @ D_kh (block-banded over Wp) ----
    S = np.zeros((3, Wp, Wp), np.float32)                           # S[kw, jp, j]
    for kw in range(3):
        for j in range(Wp):
            jp = j + kw - 1
            if 0 <= jp < Wp:
                S[kw, jp, j] = 1.0
    S = jnp.asarray(S)
    eye_c = jnp.eye(Cb, dtype=f32)
    wk = []
    for kh in range(3):
        band = jnp.einsum('kpj,kc->pcj', S, dwb[kh])                # (Wp, Cb, Wp)
        D = band[:, :, :, None] * eye_c[None, :, None, :]           # (Wp,Cb,Wp,Cb)
        wk.append(wpc2 @ D.reshape(WL, WL))                         # (2*W*C, WL)
    wcat = jnp.concatenate(wk, axis=1).astype(jnp.bfloat16)         # (2*W*C, 3*WL)

    # --- per-lane PReLU alphas after the depthwise conv -----------------------
    adw = jnp.tile(jnp.concatenate([jnp.full((C2,), a1, f32),
                                    jnp.full((C2,), a2, f32)]),
                   Wp)[None, :]                                     # (1, WL)

    # --- pwconv folded into ConvTranspose2d: F[d,k,i,o]=sum_m pw[m,i]*up[m,o,d,k]
    f1 = jnp.einsum('mi,modk->dkio', pw1[:, :, 0, 0], up1)          # (2,2,C2,C2)
    f2 = jnp.einsum('mi,modk->dkio', pw2[:, :, 0, 0], up2)
    wsm = jnp.zeros((Cb, 2, 2, Cb), f32)                            # [cin, di, dj, cout]
    wsm = wsm.at[:C2, :, :, :C2].set(jnp.transpose(f1, (2, 0, 1, 3)))
    wsm = wsm.at[C2:, :, :, C2:].set(jnp.transpose(f2, (2, 0, 1, 3)))
    eye = jnp.eye(Wp, dtype=f32)
    wup = jnp.concatenate(
        [jnp.kron(eye, wsm[:, di].reshape(Cb, 2 * Cb)) for di in range(2)],
        axis=1).astype(jnp.bfloat16)                                # (WL, 2*W*C)

    am = jnp.array([am_s], f32)
    return wcat, adw, wup, am


def spatial_squeeze_module_nhwc(x_nhwc, w1, dw1, pw1, up1, dw2, pw2, up2,
                                a1, a2, am_s):
    """NHWC forward pass. x_nhwc: (B, H, W, C) float32."""
    B, H, W, C = x_nhwc.shape
    C2 = C // 2
    Cb = 2 * C2
    Hp, Wp = H // 2, W // 2
    WL = Wp * Cb
    WC = W * C
    f32 = jnp.float32

    wcat, adw, wup, am = _prepare_weights(C, W, w1, dw1, pw1, up1,
                                          dw2, pw2, up2, a1, a2, am_s)

    # Row-pair-packed, lane-dense activation layout: a FREE reshape of NHWC.
    x_k = x_nhwc.astype(f32).reshape(B * Hp, 2 * WC)

    def full(shape):
        return pl.BlockSpec(shape, lambda i, _n=len(shape): (0,) * _n)

    out_k = pl.pallas_call(
        _make_kernel(B, Hp, Wp, Cb),
        out_shape=jax.ShapeDtypeStruct((B * Hp, 2 * WC), f32),
        grid_spec=pltpu.PrefetchScalarGridSpec(
            num_scalar_prefetch=0,
            grid=(1,),                                      # whole problem in one step
            in_specs=[
                full((B * Hp, 2 * WC)),                     # x (row-pair packed)
                full((2 * WC, 3 * WL)),                     # pool+conv1+dw-horiz (bf16)
                full((1, WL)),                              # depthwise PReLU alphas
                full((WL, 2 * WC)),                         # fused pw + upsample (bf16)
                pl.BlockSpec(memory_space=pltpu.MemorySpace.SMEM),  # module PReLU alpha
            ],
            out_specs=full((B * Hp, 2 * WC)),
        ),
        input_output_aliases={0: 0},                        # output reuses x's buffer
        compiler_params=pltpu.CompilerParams(
            dimension_semantics=("arbitrary",)),
    )(x_k, wcat, adw, wup, am)

    return out_k.reshape(B, H, W, C)                        # free reshape back


def spatial_squeeze_module(x_nchw, w1, dw1, pw1, up1, dw2, pw2, up2, a1, a2, am_s):
    """NCHW shim matching the torch module interface (weights in torch layout)."""
    x_nhwc = jnp.transpose(x_nchw, (0, 2, 3, 1))
    out_nhwc = spatial_squeeze_module_nhwc(x_nhwc, w1, dw1, pw1, up1,
                                           dw2, pw2, up2, a1, a2, am_s)
    return jnp.transpose(out_nhwc, (0, 3, 1, 2))


# ---------- pure-JAX (NCHW, torch-semantics) reference for validation ----------
def reference_forward(x, p):
    B, C, H, W = x.shape
    C2 = C // 2
    groups = C
    cpg = C // groups
    y = x.reshape(B, groups, cpg, H, W).transpose(0, 2, 1, 3, 4).reshape(B, -1, H, W)
    y0 = y
    y = jnp.einsum('bchw,oc->bohw', y, p['w1'][:, :, 0, 0])

    def block(yy, dw, a, pw, up):
        yp = yy.reshape(B, C2, H // 2, 2, W // 2, 2).mean(axis=(3, 5))
        yd = jax.lax.conv_general_dilated(
            yp, dw, (1, 1), ((1, 1), (1, 1)),
            dimension_numbers=('NCHW', 'OIHW', 'NCHW'),
            feature_group_count=C2)
        yd = jnp.where(yd > 0, yd, a * yd)
        yq = jnp.einsum('bchw,oc->bohw', yd, pw[:, :, 0, 0])
        t = jnp.einsum('bchw,codk->bohdwk', yq, up)   # ConvTranspose2d(k=2, s=2)
        return t.reshape(B, C2, H, W)

    y1 = block(y, p['dw1'], p['a1'], p['pw1'], p['up1'])
    y2 = block(y, p['dw2'], p['a2'], p['pw2'], p['up2'])
    out = jnp.concatenate([y1, y2], axis=1) + y0
    return jnp.where(out > 0, out, p['am'] * out)


if __name__ == "__main__":
    B, C, H, W = 2, 8, 16, 16
    C2 = C // 2

    key = jax.random.PRNGKey(0)
    ks = jax.random.split(key, 8)
    # torch-layout parameters (shapes exactly as in the nn.Module __init__)
    w1_t = jax.random.normal(ks[0], (C2, C, 1, 1), jnp.float32) * 0.3    # conv1
    dw1_t = jax.random.normal(ks[1], (C2, 1, 3, 3), jnp.float32) * 0.3   # squeeze1.dwconv
    pw1_t = jax.random.normal(ks[2], (C2, C2, 1, 1), jnp.float32) * 0.3  # squeeze1.pwconv
    up1_t = jax.random.normal(ks[3], (C2, C2, 2, 2), jnp.float32) * 0.3  # squeeze1.upsample
    dw2_t = jax.random.normal(ks[4], (C2, 1, 3, 3), jnp.float32) * 0.3
    pw2_t = jax.random.normal(ks[5], (C2, C2, 1, 1), jnp.float32) * 0.3
    up2_t = jax.random.normal(ks[6], (C2, C2, 2, 2), jnp.float32) * 0.3
    a1, a2, am = 0.25, 0.20, 0.30                                        # PReLU scalars

    x_nchw = jax.random.normal(ks[7], (B, C, H, W), jnp.float32)

    out_nchw = spatial_squeeze_module(x_nchw, w1_t, dw1_t, pw1_t, up1_t,
                                      dw2_t, pw2_t, up2_t, a1, a2, am)
    out_nchw = jax.block_until_ready(out_nchw)

    ref = reference_forward(x_nchw, dict(w1=w1_t, dw1=dw1_t, pw1=pw1_t, up1=up1_t,
                                         dw2=dw2_t, pw2=pw2_t, up2=up2_t,
                                         a1=a1, a2=a2, am=am))
    ref = jax.block_until_ready(ref)

    assert out_nchw.shape == (B, C, H, W)
    # Tolerance reflects bf16 MXU operands (per perf review); the residual and
    # all elementwise math remain f32, so errors only come from the two matmuls.
    max_err = float(jnp.max(jnp.abs(out_nchw - ref)))
    assert jnp.allclose(out_nchw, ref, atol=2e-2, rtol=2e-2), max_err
    print("KERNEL_OK")
</pallas_src>

<mosaic_0001>
module attributes {stable_mosaic.version = 11 : i64} {
  func.func @kernel(%arg0: i32, %arg1: memref<16x256xf32, #tpu.memory_space<vmem>>, %arg2: memref<256x192xbf16, #tpu.memory_space<vmem>>, %arg3: memref<1x64xf32, #tpu.memory_space<vmem>>, %arg4: memref<64x256xbf16, #tpu.memory_space<vmem>>, %arg5: memref<1xf32, #tpu.memory_space<smem>>, %arg6: memref<16x256xf32, #tpu.memory_space<vmem>>) attributes {dimension_semantics = [#tpu.dimension_semantics<arbitrary>], iteration_bounds = array<i64: 1>, scalar_prefetch = 0 : i64, scratch_operands = 0 : i64, tpu.core_type = #tpu.core_type<tc>, window_params = [{pipeline_mode = #tpu.pipeline_mode<synchronous>, transform_indices = @transform_0, window_bounds = array<i64: 16, 256>}, {pipeline_mode = #tpu.pipeline_mode<synchronous>, transform_indices = @transform_1, window_bounds = array<i64: 256, 192>}, {pipeline_mode = #tpu.pipeline_mode<synchronous>, transform_indices = @transform_2, window_bounds = array<i64: 1, 64>}, {pipeline_mode = #tpu.pipeline_mode<synchronous>, transform_indices = @transform_3, window_bounds = array<i64: 64, 256>}, {transform_indices = @transform_4, window_bounds = array<i64: 1>}, {pipeline_mode = #tpu.pipeline_mode<synchronous>, transform_indices = @transform_5, window_bounds = array<i64: 16, 256>}]} {
    %c0 = arith.constant 0 : index
    %c0_0 = arith.constant 0 : index
    %0 = vector.load %arg1[%c0, %c0_0] : memref<16x256xf32, #tpu.memory_space<vmem>>, vector<16x256xf32>
    %1 = arith.truncf %0 : vector<16x256xf32> to vector<16x256xbf16>
    %c0_1 = arith.constant 0 : index
    %c0_2 = arith.constant 0 : index
    %2 = vector.load %arg2[%c0_1, %c0_2] : memref<256x192xbf16, #tpu.memory_space<vmem>>, vector<256x192xbf16>
    %cst = arith.constant dense<0.000000e+00> : vector<16x192xf32>
    %3 = tpu.matmul %1, %2, %cst {dimension_numbers = #tpu.dot_dimension_numbers<[1], [0], [0], [1], [0, 0, 1, 1], [], []>} : vector<16x256xbf16>, vector<256x192xbf16>, vector<16x192xf32> -> vector<16x192xf32>
    %4 = vector.shape_cast %3 : vector<16x192xf32> to vector<2x8x192xf32>
    %cst_3 = arith.constant 0.000000e+00 : f32
    %5 = vector.broadcast %cst_3 : f32 to vector<2x1x64xf32>
    %6 = vector.extract_strided_slice %4 {offsets = [0, 0, 0], sizes = [2, 7, 64], strides = [1, 1, 1]} : vector<2x8x192xf32> to vector<2x7x64xf32>
    %7 = tpu.concatenate %5, %6 in 1 : vector<2x1x64xf32>, vector<2x7x64xf32> -> vector<2x8x64xf32>
    %8 = vector.extract_strided_slice %4 {offsets = [0, 0, 64], sizes = [2, 8, 64], strides = [1, 1, 1]} : vector<2x8x192xf32> to vector<2x8x64xf32>
    %9 = arith.addf %7, %8 : vector<2x8x64xf32>
    %10 = vector.extract_strided_slice %4 {offsets = [0, 1, 128], sizes = [2, 7, 64], strides = [1, 1, 1]} : vector<2x8x192xf32> to vector<2x7x64xf32>
    %11 = tpu.concatenate %10, %5 in 1 : vector<2x7x64xf32>, vector<2x1x64xf32> -> vector<2x8x64xf32>
    %12 = arith.addf %9, %11 : vector<2x8x64xf32>
    %cst_4 = arith.constant 0.000000e+00 : f32
    %13 = vector.broadcast %cst_4 : f32 to vector<2x8x64xf32>
    %14 = arith.cmpf ogt, %12, %13 : vector<2x8x64xf32>
    %c0_5 = arith.constant 0 : index
    %c0_6 = arith.constant 0 : index
    %15 = vector.load %arg3[%c0_5, %c0_6] : memref<1x64xf32, #tpu.memory_space<vmem>>, vector<1x64xf32>
    %16 = vector.shape_cast %15 : vector<1x64xf32> to vector<64xf32>
    %17 = vector.shape_cast %16 : vector<64xf32> to vector<1x1x64xf32>
    %18 = vector.broadcast %17 : vector<1x1x64xf32> to vector<2x8x64xf32>
    %19 = arith.mulf %12, %18 : vector<2x8x64xf32>
    %20 = arith.select %14, %12, %19 : vector<2x8x64xi1>, vector<2x8x64xf32>
    %21 = vector.shape_cast %20 : vector<2x8x64xf32> to vector<16x64xf32>
    %22 = arith.truncf %21 : vector<16x64xf32> to vector<16x64xbf16>
    %c0_7 = arith.constant 0 : index
    %c0_8 = arith.constant 0 : index
    %23 = vector.load %arg4[%c0_7, %c0_8] : memref<64x256xbf16, #tpu.memory_space<vmem>>, vector<64x256xbf16>
    %cst_9 = arith.constant dense<0.000000e+00> : vector<16x256xf32>
    %24 = tpu.matmul %22, %23, %cst_9 {dimension_numbers = #tpu.dot_dimension_numbers<[1], [0], [0], [1], [0, 0, 1, 1], [], []>} : vector<16x64xbf16>, vector<64x256xbf16>, vector<16x256xf32> -> vector<16x256xf32>
    %25 = arith.addf %24, %0 : vector<16x256xf32>
    %c0_10 = arith.constant 0 : index
    %26 = memref.load %arg5[%c0_10] : memref<1xf32, #tpu.memory_space<smem>>
    %cst_11 = arith.constant 0.000000e+00 : f32
    %27 = vector.broadcast %cst_11 : f32 to vector<16x256xf32>
    %28 = arith.cmpf ogt, %25, %27 : vector<16x256xf32>
    %29 = vector.broadcast %26 : f32 to vector<16x256xf32>
    %30 = arith.mulf %29, %25 : vector<16x256xf32>
    %31 = arith.select %28, %25, %30 : vector<16x256xi1>, vector<16x256xf32>
    %c0_12 = arith.constant 0 : index
    %c0_13 = arith.constant 0 : index
    %32 = vector.load %arg6[%c0_12, %c0_13] : memref<16x256xf32, #tpu.memory_space<vmem>>, vector<16x256xf32>
    tpu.vector_store %arg6[%c0_12, %c0_13], %31 {strides = array<i32>} : memref<16x256xf32, #tpu.memory_space<vmem>>, vector<16x256xf32>,
    return
  }
  func.func @transform_0(%arg0: i32) -> (i32, i32) {
    %c0_i32 = arith.constant 0 : i32
    %c0_i32_0 = arith.constant 0 : i32
    %c0_i32_1 = arith.constant 0 : i32
    return %c0_i32, %c0_i32_0 : i32, i32
  }
  func.func @transform_1(%arg0: i32) -> (i32, i32) {
    %c0_i32 = arith.constant 0 : i32
    %c0_i32_0 = arith.constant 0 : i32
    %c0_i32_1 = arith.constant 0 : i32
    return %c0_i32, %c0_i32_0 : i32, i32
  }
  func.func @transform_2(%arg0: i32) -> (i32, i32) {
    %c0_i32 = arith.constant 0 : i32
    %c0_i32_0 = arith.constant 0 : i32
    %c0_i32_1 = arith.constant 0 : i32
    return %c0_i32, %c0_i32_0 : i32, i32
  }
  func.func @transform_3(%arg0: i32) -> (i32, i32) {
    %c0_i32 = arith.constant 0 : i32
    %c0_i32_0 = arith.constant 0 : i32
    %c0_i32_1 = arith.constant 0 : i32
    return %c0_i32, %c0_i32_0 : i32, i32
  }
  func.func @transform_4(%arg0: i32) -> i32 {
    %c0_i32 = arith.constant 0 : i32
    %c0_i32_0 = arith.constant 0 : i32
    return %c0_i32 : i32
  }
  func.func @transform_5(%arg0: i32) -> (i32, i32) {
    %c0_i32 = arith.constant 0 : i32
    %c0_i32_0 = arith.constant 0 : i32
    %c0_i32_1 = arith.constant 0 : i32
    return %c0_i32, %c0_i32_0 : i32, i32
  }
}

</mosaic_0001>

<bundles_post_ra>
// kernel: tpu_custom_call.1
= control target key start
LH: loop header
LB: loop body
LE: loop exit
PB: predicated region body
PF: predicated region fallthrough
CT: control target
= control target key end

     0   :  { %11 = vsyncpa [#allocation4], 0  ;;  %s1018_s0 = inlined_call_operand.hbm [shape: f32[16,256], index: 0, kind: input, shape index: {}, may-alias: {0,5}]   ;;  %s1019_s1 = inlined_call_operand.vmem [shape: bf16[256,192], index: 1, kind: input, shape index: {}]   ;;  %s1020_s2 = inlined_call_operand.vmem [shape: f32[1,64], index: 2, kind: input, shape index: {}]   ;;  %s1021_s3 = inlined_call_operand.vmem [shape: bf16[64,256], index: 3, kind: input, shape index: {}]   ;;  %s1022_s4 = inlined_call_operand.<no memory space> [shape: f32[1], index: 4, kind: input, shape index: {}]   ;;  %s1023_s5 = inlined_call_operand.hbm [shape: f32[16,256], index: 5, kind: output, shape index: {}, may-alias: {0,5}]  }
   0x1   :  { %12 = vsyncpa [#allocation5], 0  ;;  %s17_s20 = sshll.u32 %s1018_s0, 4  ;;  %s709_s21 = smov [#allocation3]   ;;  %s18_s20 = int_to_ptr.hbm [resolvable:$true] %s17_s20 }
   0x2   :  { %s19_s22 = sshll.u32 %s709_s21, 4  ;;  %s710_s23 = smov 256   ;;  %s20_s22 = int_to_ptr.vmem [resolvable:$true] %s19_s22 }
   0x3   :  { %s711_s24 = smov 16  }
   0x4   :  { %25 = dma.hbm_to_vmem [thread:$0]  %s18_s20, 512, %s20_s22, [#allocation4], %s710_s23, %s710_s23, %s711_s24  }
   0x5   :  { %705 = dma.done.wait [#allocation4], 512  }
   0x6   :  { %706 = vsyncadd [#allocation4], 4294966784  ;;  %v507_v0 = vld [vmem:[%s1019_s1 + $0x70] sm:$0xf]  ;;  %v626_v1 = vld [vmem:[%s1019_s1 + $0x74] sm:$0xf0] }
   0x7   :  { %v571_v2 = vld [vmem:[%s1019_s1 + $0xf0] sm:$0xf]  ;;  %v508_v3 = vor.u32 %v626_v1, %v507_v0  ;;  %v642_v4 = vld [vmem:[%s1019_s1 + $0xf4] sm:$0xf0]  ;;  %v499_v5 = vld [vmem:[%s1019_s1 + $0x60] sm:$0xf] }
   0x8   :  { %v624_v6 = vld [vmem:[%s1019_s1 + $0x64] sm:$0xf0]  ;;  %v572_v7 = vor.u32 %v642_v4, %v571_v2  ;;  %v563_v8 = vld [vmem:[%s1019_s1 + $0xe0] sm:$0xf]  ;;  %v491_v12 = vld [vmem:[%s1019_s1 + $0x50] sm:$0xf] }
   0x9   :  { %v640_v9 = vld [vmem:[%s1019_s1 + $0xe4] sm:$0xf0]  ;;  %237 = vmatpush.bf16.msra.mxu0 %v508_v3  ;;  %v500_v10 = vor.u32 %v624_v6, %v499_v5  ;;  %v622_v13 = vld [vmem:[%s1019_s1 + $0x54] sm:$0xf0]  ;;  %v555_v14 = vld [vmem:[%s1019_s1 + $0xd0] sm:$0xf] }
   0xa   :  { %251 = vmatpush.bf16.msra.mxu1 %v572_v7  ;;  %v564_v11 = vor.u32 %v640_v9, %v563_v8  ;;  %v638_v15 = vld [vmem:[%s1019_s1 + $0xd4] sm:$0xf0]  ;;  %v492_v16 = vor.u32 %v622_v13, %v491_v12  ;;  %v483_v18 = vld [vmem:[%s1019_s1 + $0x40] sm:$0xf]  ;;  %v620_v19 = vld [vmem:[%s1019_s1 + $0x44] sm:$0xf0] }
   0xb   :  { %v556_v17 = vor.u32 %v638_v15, %v555_v14  ;;  %v547_v20 = vld [vmem:[%s1019_s1 + $0xc0] sm:$0xf]  ;;  %v636_v21 = vld [vmem:[%s1019_s1 + $0xc4] sm:$0xf0]  ;;  %v475_v22 = vld [vmem:[%s1019_s1 + $0x30] sm:$0xf]  ;;  %v484_v23 = vor.u32 %v620_v19, %v483_v18 }
   0xc   :  { %v618_v24 = vld [vmem:[%s1019_s1 + $0x34] sm:$0xf0]  ;;  %v539_v25 = vld [vmem:[%s1019_s1 + $0xb0] sm:$0xf]  ;;  %v548_v27 = vor.u32 %v636_v21, %v547_v20  ;;  %v625_v28 = vld [vmem:[%s1019_s1 + $0x74] sm:$0xf] }
   0xd   :  { %238 = vmatpush.bf16.msra.mxu0 %v500_v10  ;;  %v634_v26 = vld [vmem:[%s1019_s1 + $0xb4] sm:$0xf0]  ;;  %v509_v29 = vld [vmem:[%s1019_s1 + $0x78] sm:$0xf0]  ;;  %v641_v30 = vld [vmem:[%s1019_s1 + $0xf4] sm:$0xf]  ;;  %v476_v38 = vor.u32 %v618_v24, %v475_v22 }
   0xe   :  { %252 = vmatpush.bf16.msra.mxu1 %v564_v11  ;;  %v512_v31 = vor.u32 %v625_v28, %v509_v29  ;;  %v573_v32 = vld [vmem:[%s1019_s1 + $0xf8] sm:$0xf0]  ;;  %v623_v33 = vld [vmem:[%s1019_s1 + $0x64] sm:$0xf]  ;;  %v501_v34 = vld [vmem:[%s1019_s1 + $0x68] sm:$0xf0]  ;;  %v540_v42 = vor.u32 %v634_v26, %v539_v25 }
   0xf   :  { %v576_v35 = vor.u32 %v641_v30, %v573_v32  ;;  %v639_v36 = vld [vmem:[%s1019_s1 + $0xe4] sm:$0xf]  ;;  %v565_v37 = vld [vmem:[%s1019_s1 + $0xe8] sm:$0xf0]  ;;  %v467_v39 = vld [vmem:[%s1019_s1 + $0x20] sm:$0xf]  ;;  %v504_v41 = vor.u32 %v623_v33, %v501_v34 }
  0x10   :  { %v616_v40 = vld [vmem:[%s1019_s1 + $0x24] sm:$0xf0]  ;;  %265 = vmatpush.bf16.msra.mxu2 %v512_v31  ;;  %v531_v43 = vld [vmem:[%s1019_s1 + $0xa0] sm:$0xf]  ;;  %v568_v44 = vor.u32 %v639_v36, %v565_v37  ;;  %v621_v45 = vld [vmem:[%s1019_s1 + $0x54] sm:$0xf] }
  0x11   :  { %239 = vmatpush.bf16.msra.mxu0 %v492_v16  ;;  %279 = vmatpush.bf16.msra.mxu3 %v576_v35  ;;  %v493_v46 = vld [vmem:[%s1019_s1 + $0x58] sm:$0xf0]  ;;  %v632_v47 = vld [vmem:[%s1019_s1 + $0xa4] sm:$0xf0]  ;;  %v637_v48 = vld [vmem:[%s1019_s1 + $0xd4] sm:$0xf]  ;;  %v468_v50 = vor.u32 %v616_v40, %v467_v39 }
  0x12   :  { %253 = vmatpush.bf16.msra.mxu1 %v556_v17  ;;  %v557_v49 = vld [vmem:[%s1019_s1 + $0xd8] sm:$0xf0]  ;;  %v459_v51 = vld [vmem:[%s1019_s1 + $0x10] sm:$0xf]  ;;  %v614_v52 = vld [vmem:[%s1019_s1 + $0x14] sm:$0xf0]  ;;  %v496_v53 = vor.u32 %v621_v45, %v493_v46  ;;  %v532_v54 = vor.u32 %v632_v47, %v531_v43 }
  0x13   :  { %v523_v55 = vld [vmem:[%s1019_s1 + $0x90] sm:$0xf]  ;;  %v560_v56 = vor.u32 %v637_v48, %v557_v49  ;;  %v619_v57 = vld [vmem:[%s1019_s1 + $0x44] sm:$0xf]  ;;  %v485_v58 = vld [vmem:[%s1019_s1 + $0x48] sm:$0xf0]  ;;  %v460_v62 = vor.u32 %v614_v52, %v459_v51 }
  0x14   :  { %266 = vmatpush.bf16.msra.mxu2 %v504_v41  ;;  %v630_v59 = vld [vmem:[%s1019_s1 + $0x94] sm:$0xf0]  ;;  %v635_v60 = vld [vmem:[%s1019_s1 + $0xc4] sm:$0xf]  ;;  %v549_v61 = vld [vmem:[%s1019_s1 + $0xc8] sm:$0xf0]  ;;  %v488_v1 = vor.u32 %v619_v57, %v485_v58 }
  0x15   :  { %240 = vmatpush.bf16.msra.mxu0 %v484_v23  ;;  %280 = vmatpush.bf16.msra.mxu3 %v568_v44  ;;  %v451_v63 = vld [vmem:[%s1019_s1] sm:$0xf]  ;;  %v612_v0 = vld [vmem:[%s1019_s1 + $0x4] sm:$0xf0]  ;;  %v524_v2 = vor.u32 %v630_v59, %v523_v55  ;;  %v552_v4 = vor.u32 %v635_v60, %v549_v61  ;;  %v617_v5 = vld [vmem:[%s1019_s1 + $0x34] sm:$0xf] }
  0x16   :  { %254 = vmatpush.bf16.msra.mxu1 %v548_v27  ;;  %v515_v3 = vld [vmem:[%s1019_s1 + $0x80] sm:$0xf]  ;;  %v477_v6 = vld [vmem:[%s1019_s1 + $0x38] sm:$0xf0]  ;;  %v628_v7 = vld [vmem:[%s1019_s1 + $0x84] sm:$0xf0]  ;;  %v452_v10 = vor.u32 %v612_v0, %v451_v63 }
  0x17   :  { %v633_v8 = vld [vmem:[%s1019_s1 + $0xb4] sm:$0xf]  ;;  %v541_v9 = vld [vmem:[%s1019_s1 + $0xb8] sm:$0xf0]  ;;  %v906_v11 = vld [vmem:[#allocation3] sm:$0xff]  ;;  %v480_v14 = vor.u32 %v617_v5, %v477_v6  ;;  %v516_v15 = vor.u32 %v628_v7, %v515_v3  ;;  %s712_s7 = smov 64  }
  0x18   :  { %267 = vmatpush.bf16.msra.mxu2 %v496_v53  ;;  %v908_v12 = vld [vmem:[#allocation3 + $0x10] sm:$0xff]  ;;  %v910_v13 = vld [vmem:[#allocation3 + $0x8] sm:$0xff]  ;;  %v912_v16 = vld [vmem:[#allocation3 + $0x18] sm:$0xff]  ;;  %v544_v17 = vor.u32 %v633_v8, %v541_v9  ;;  %vm299_vm0 = vcmask 1040384   ;;  %vm316_vm1 = vcmask 1046528   ;;  %vm380_vm4 = vcmask 523264  }
  0x19   :  { %241 = vmatpush.bf16.msra.mxu0 %v476_v38  ;;  %281 = vmatpush.bf16.msra.mxu3 %v560_v56  ;;  %v615_v18 = vld [vmem:[%s1019_s1 + $0x24] sm:$0xf]  ;;  %v469_v19 = vld [vmem:[%s1019_s1 + $0x28] sm:$0xf0]  ;;  %v43_v22 = vpack.c.bf16 %v908_v12, %v906_v11  ;;  %v44_v23 = vpack.c.bf16 %v912_v16, %v910_v13  ;;  %v613_v26 = vld [vmem:[%s1019_s1 + $0x14] sm:$0xf] }
  0x1a   :  { %255 = vmatpush.bf16.msra.mxu1 %v540_v42  ;;  %v631_v20 = vld [vmem:[%s1019_s1 + $0xa4] sm:$0xf]  ;;  %v533_v21 = vld [vmem:[%s1019_s1 + $0xa8] sm:$0xf0]  ;;  %v472_v24 = vor.u32 %v615_v18, %v469_v19  ;;  %v461_v27 = vld [vmem:[%s1019_s1 + $0x18] sm:$0xf0] }
  0x1b   :  { %v536_v25 = vor.u32 %v631_v20, %v533_v21  ;;  %v629_v28 = vld [vmem:[%s1019_s1 + $0x94] sm:$0xf]  ;;  %v525_v29 = vld [vmem:[%s1019_s1 + $0x98] sm:$0xf0]  ;;  %v464_v30 = vor.u32 %v613_v26, %v461_v27  ;;  %v611_v32 = vld [vmem:[%s1019_s1 + $0x4] sm:$0xf] }
  0x1c   :  { %268 = vmatpush.bf16.msra.mxu2 %v488_v1  ;;  %v528_v31 = vor.u32 %v629_v28, %v525_v29  ;;  %v453_v33 = vld [vmem:[%s1019_s1 + $0x8] sm:$0xf0]  ;;  %v627_v34 = vld [vmem:[%s1019_s1 + $0x84] sm:$0xf]  ;;  %v603_v44 = vld [vmem:[%s1021_s3 + $0x30] sm:$0xf] }
  0x1d   :  { %242 = vmatpush.bf16.msra.mxu0 %v468_v50  ;;  %282 = vmatpush.bf16.msra.mxu3 %v552_v4  ;;  %v517_v35 = vld [vmem:[%s1019_s1 + $0x88] sm:$0xf0]  ;;  %v456_v36 = vor.u32 %v611_v32, %v453_v33  ;;  %v650_v45 = vld [vmem:[%s1021_s3 + $0x34] sm:$0xf0]  ;;  %v649_v46 = vld [vmem:[%s1021_s3 + $0x34] sm:$0xf] }
  0x1e   :  { %256 = vmatpush.bf16.msra.mxu1 %v532_v54  ;;  %v520_v37 = vor.u32 %v627_v34, %v517_v35  ;;  %v604_v47 = vor.u32 %v650_v45, %v603_v44  ;;  %v605_v48 = vld [vmem:[%s1021_s3 + $0x38] sm:$0xf0]  ;;  %v595_v50 = vld [vmem:[%s1021_s3 + $0x20] sm:$0xf]  ;;  %v648_v51 = vld [vmem:[%s1021_s3 + $0x24] sm:$0xf0]  ;;  %v417_v35 = vstv %s1022_s4 }
  0x1f   :  { %v608_v49 = vor.u32 %v649_v46, %v605_v48  ;;  %v647_v52 = vld [vmem:[%s1021_s3 + $0x24] sm:$0xf]  ;;  %v596_v53 = vor.u32 %v648_v51, %v595_v50  ;;  %v597_v54 = vld [vmem:[%s1021_s3 + $0x28] sm:$0xf0]  ;;  %v587_v56 = vld [vmem:[%s1021_s3 + $0x10] sm:$0xf] }
  0x20   :  { %269 = vmatpush.bf16.msra.mxu2 %v480_v14  ;;  %v600_v55 = vor.u32 %v647_v52, %v597_v54  ;;  %v646_v57 = vld [vmem:[%s1021_s3 + $0x14] sm:$0xf0]  ;;  %v645_v58 = vld [vmem:[%s1021_s3 + $0x14] sm:$0xf]  ;;  %v589_v60 = vld [vmem:[%s1021_s3 + $0x18] sm:$0xf0] }
  0x21   :  { %243 = vmatpush.bf16.msra.mxu0 %v460_v62  ;;  %283 = vmatpush.bf16.msra.mxu3 %v544_v17  ;;  %v588_v59 = vor.u32 %v646_v57, %v587_v56  ;;  %v592_v61 = vor.u32 %v645_v58, %v589_v60  ;;  %v579_v62 = vld [vmem:[%s1021_s3] sm:$0xf]  ;;  %v644_v63 = vld [vmem:[%s1021_s3 + $0x4] sm:$0xf0]  ;;  %v643_v0 = vld [vmem:[%s1021_s3 + $0x4] sm:$0xf] }
  0x22   :  { %257 = vmatpush.bf16.msra.mxu1 %v524_v2  ;;  %v580_v1 = vor.u32 %v644_v63, %v579_v62  ;;  %v581_v2 = vld [vmem:[%s1021_s3 + $0x8] sm:$0xf0]  ;;  %s436_s19 = sshll.u32 %s1023_s5, 4  ;;  %s437_s19 = int_to_ptr.hbm [resolvable:$true] %s436_s19 }
  0x23   :  { %v584_v3 = vor.u32 %v643_v0, %v581_v2 }
  0x24   :  { %270 = vmatpush.bf16.msra.mxu2 %v472_v24 }
  0x25   :  { %244 = vmatpush.bf16.msra.mxu0 %v452_v10  ;;  %284 = vmatpush.bf16.msra.mxu3 %v536_v25 }
  0x26   :  { %258 = vmatpush.bf16.msra.mxu1 %v516_v15 }
  0x28   :  { %245 = vmatmul.bf16.vlgmr.msra.gmra.mxu0 %v43_v22  ;;  %271 = vmatpush.bf16.msra.mxu2 %v464_v30 }
  0x29   :  { %259 = vmatmul.bf16.vlgmr.msra.gmra.mxu1 %v44_v23  ;;  %285 = vmatpush.bf16.msra.mxu3 %v528_v31 }
  0x2a   :  { %388 = vmatpush.bf16.msrb.mxu0 %v604_v47  ;;  %402 = vmatpush.bf16.msrb.mxu1 %v608_v49 }
  0x2c   :  { %272 = vmatpush.bf16.msra.mxu2 %v456_v36 }
  0x2d   :  { %286 = vmatpush.bf16.msra.mxu3 %v520_v37 }
  0x2e   :  { %389 = vmatpush.bf16.msrb.mxu0 %v596_v53  ;;  %403 = vmatpush.bf16.msrb.mxu1 %v600_v55 }
  0x2f   :  { %273 = vmatmul.bf16.vlgmr.msra.gmra.mxu2 %v43_v22  ;;  %v656_v22 = vld [vmem:[%s1020_s2] ss:$0 sm:$0xff]  ;;  %s713_s2 = smov [#allocation6]  }
  0x30   :  { %287 = vmatmul.bf16.vlgmr.msra.gmra.mxu3 %v44_v23  ;;  %s434_s4 = sshll.u32 %s713_s2, 4  ;;  %s435_s4 = int_to_ptr.vmem [resolvable:$true] %s434_s4 }
  0x32   :  { %390 = vmatpush.bf16.msrb.mxu0 %v588_v59  ;;  %404 = vmatpush.bf16.msrb.mxu1 %v592_v61 }
  0x36   :  { %391 = vmatpush.bf16.msrb.mxu0 %v580_v1  ;;  %405 = vmatpush.bf16.msrb.mxu1 %v584_v3 }
  0xa5   :  { %v246_v38 = vpop.f32.mrf.mxu0 }
  0xa6   :  { %v260_v39 = vpop.f32.mrf.mxu1 }
  0xa7   :  { %v261_v40 = vadd.f32 %v260_v39, %v246_v38 }
  0xa9   :  { %302 = vrot.lane.b32.xlu0 %v261_v40, %s712_s7  ;;  %v295_v7 = vrot.slane %v261_v40, 7 }
  0xab   :  { %v300_v17 = vsel %vm299_vm0, 0.0, %v295_v7 }
  0xad   :  { %v248_v41 = vpop.f32.mrf.mxu0 }
  0xae   :  { %v262_v42 = vpop.f32.mrf.mxu1 }
  0xaf   :  { %v263_v43 = vadd.f32 %v262_v42, %v248_v41 }
  0xb1   :  { %304 = vrot.lane.b32.xlu0 %v263_v43, %s712_s7  ;;  %v296_v19 = vrot.slane %v263_v43, 7 }
  0xb2   :  { %v274_v4 = vpop.f32.mrf.mxu2 }
  0xb3   :  { %v288_v5 = vpop.f32.mrf.mxu3  ;;  %v301_v25 = vsel %vm299_vm0, 0.0, %v296_v19 }
  0xb4   :  { %v289_v6 = vadd.f32 %v288_v5, %v274_v4 }
  0xb6   :  { %v312_v10 = vrot.slane %v289_v6, 1 }
  0xb8   :  { %v317_v20 = vsel %vm316_vm1, %v312_v10, 0.0 }
  0xba   :  { %v276_v8 = vpop.f32.mrf.mxu2 }
  0xbb   :  { %v290_v9 = vpop.f32.mrf.mxu3 }
  0xbc   :  { %v291_v15 = vadd.f32 %v290_v9, %v276_v8 }
  0xbe   :  { %v313_v21 = vrot.slane %v291_v15, 1 }
  0xc0   :  { %v318_v27 = vsel %vm316_vm1, %v313_v21, 0.0 }
 0x11b   :  { %v303_v14 = vpop.permute.xlu0 %302 }
 0x11c   :  { %v308_v18 = vadd.f32 %v303_v14, %v300_v17 }
 0x11e   :  { %v319_v23 = vadd.f32 %v317_v20, %v308_v18 }
 0x120   :  { %v327_v28 = vmul.f32 %v656_v22, %v319_v23  ;;  %vm321_vm2 = vcmp.gt.f32.partialorder %v319_v23, 0.0 }
 0x122   :  { %v329_v31 = vsel %vm321_vm2, %v319_v23, %v327_v28 }
 0x123   :  { %v305_v24 = vpop.permute.xlu0 %304 }
 0x124   :  { %v309_v26 = vadd.f32 %v305_v24, %v301_v25 }
 0x126   :  { %v320_v29 = vadd.f32 %v318_v27, %v309_v26 }
 0x128   :  { %vm322_vm3 = vcmp.gt.f32.partialorder %v320_v29, 0.0  ;;  %v328_v30 = vmul.f32 %v656_v22, %v320_v29 }
 0x12a   :  { %v330_v32 = vsel %vm322_vm3, %v320_v29, %v328_v30 }
 0x12b   :  { %v331_v33 = vpack.c.bf16 %v330_v32, %v329_v31 }
 0x12d   :  { %609 = vmatmul.msk.bf16.vlgmr.msrb.gmra.mxu0 %vm380_vm4, %v331_v33  ;;  %610 = vmatmul.msk.bf16.vlgmr.msrb.gmra.mxu1 %vm380_vm4, %v331_v33 }
 0x1aa   :  { %v393_v34 = vpop.f32.mrf.mxu0  ;;  %v407_v36 = vpop.f32.mrf.mxu1 }
 0x1ab   :  { %v394_v37 = vadd.f32 %v393_v34, %v906_v11  ;;  %v408_v38 = vadd.f32 %v407_v36, %v910_v13 }
 0x1ad   :  { %vm413_vm5 = vcmp.gt.f32.partialorder %v394_v37, 0.0  ;;  %v418_v39 = vmul.f32 %v417_v35, %v394_v37  ;;  %vm414_vm6 = vcmp.gt.f32.partialorder %v408_v38, 0.0  ;;  %v419_v40 = vmul.f32 %v417_v35, %v408_v38 }
 0x1af   :  { %v422_v41 = vsel %vm413_vm5, %v394_v37, %v418_v39  ;;  %v423_v42 = vsel %vm414_vm6, %v408_v38, %v419_v40 }
 0x1b0   :  { %426 = vst [vmem:[#allocation6] sm:$0xff] %v422_v41 }
 0x1b1   :  { %427 = vst [vmem:[#allocation6 + $0x8] sm:$0xff] %v423_v42 }
 0x1b2   :  { %v395_v43 = vpop.f32.mrf.mxu0  ;;  %v409_v44 = vpop.f32.mrf.mxu1 }
 0x1b3   :  { %v396_v45 = vadd.f32 %v395_v43, %v908_v12  ;;  %v410_v46 = vadd.f32 %v409_v44, %v912_v16 }
 0x1b5   :  { %vm415_vm7 = vcmp.gt.f32.partialorder %v396_v45, 0.0  ;;  %v420_v11 = vmul.f32 %v417_v35, %v396_v45  ;;  %vm416_vm8 = vcmp.gt.f32.partialorder %v410_v46, 0.0  ;;  %v421_v13 = vmul.f32 %v417_v35, %v410_v46 }
 0x1b7   :  { %v424_v47 = vsel %vm415_vm7, %v396_v45, %v420_v11  ;;  %v425_v48 = vsel %vm416_vm8, %v410_v46, %v421_v13 }
 0x1b8   :  { %428 = vst [vmem:[#allocation6 + $0x10] sm:$0xff] %v424_v47 }
 0x1b9   :  { %429 = vst [vmem:[#allocation6 + $0x18] sm:$0xff] %v425_v48 }
 0x1ba   :  { %442 = dma.vmem_to_hbm [thread:$0]  %s435_s4, 512, %s437_s19, [#allocation5], %s710_s23, %s710_s23, %s711_s24  }
 0x1bb   :  { %707 = dma.done.wait [#allocation5], 512  }
 0x1bc   :  { %708 = vsyncadd [#allocation5], 4294966784 }
 0x1bd   :  { %447 = vsyncpa [#allocation4], 1 }
 0x1be   :  { %448 = vsyncpa [#allocation5], 1 }

</bundles_post_ra>
